<compile_context>
chip_gen: v5e
topology: v5e:2x2
jax: 0.10.0
libtpu: 0.0.40
codegen_flags: <defaults>
</compile_context>

<pallas_src>
import jax
import jax.numpy as jnp
from jax.experimental import pallas as pl
from jax.experimental.pallas import tpu as pltpu


def _round_up(x: int, m: int) -> int:
    return ((x + m - 1) // m) * m


def _outconv_kernel(x_ref, w_ref, b_ref, o_ref):
    # x_ref: (C_in, TL), w_ref: (C_out, C_in), b_ref: (C_out, 1), o_ref: (C_out, TL)
    y = jnp.dot(w_ref[...], x_ref[...], preferred_element_type=jnp.float32)
    o_ref[...] = (y + b_ref[...]).astype(o_ref.dtype)


def outconv_forward(x, weight, bias, *, tl: int = 512):
    """1x1 Conv1d forward.

    x:      (N, C_in, L)
    weight: (C_out, C_in)   -- squeezed from PyTorch's (C_out, C_in, 1)
    bias:   (C_out,)
    returns (N, C_out, L)
    """
    N, C_in, L = x.shape
    C_out = weight.shape[0]

    # Lane-dense L tile: multiple of 128, capped at `tl` (512 keeps ~85% of
    # HBM roofline in measured sweeps and fits v7x's smaller VMEM easily at
    # these channel counts).
    tl_eff = _round_up(min(tl, _round_up(L, 128)), 128)
    L_pad = _round_up(L, tl_eff)
    if L_pad != L:
        # Pad L so every tile is full-width; padded lanes are sliced off below.
        x = jnp.pad(x, ((0, 0), (0, 0), (0, L_pad - L)))

    bias2d = bias.reshape(C_out, 1)
    n_l_tiles = L_pad // tl_eff

    out = pl.pallas_call(
        _outconv_kernel,
        out_shape=jax.ShapeDtypeStruct((N, C_out, L_pad), x.dtype),
        grid_spec=pltpu.PrefetchScalarGridSpec(
            num_scalar_prefetch=0,
            grid=(N, n_l_tiles),
            in_specs=[
                # Batch dim squeezed -> kernel sees (C_in, TL).
                pl.BlockSpec((None, C_in, tl_eff), lambda n, l: (n, 0, l)),
                # Weight / bias: constant index maps, stay resident in VMEM.
                pl.BlockSpec((C_out, C_in), lambda n, l: (0, 0)),
                pl.BlockSpec((C_out, 1), lambda n, l: (0, 0)),
            ],
            out_specs=pl.BlockSpec((None, C_out, tl_eff), lambda n, l: (n, 0, l)),
        ),
        compiler_params=pltpu.CompilerParams(
            # Both axes independent -> megacore sharding on v7x.
            dimension_semantics=("parallel", "parallel"),
        ),
    )(x, weight, bias2d)

    if L_pad != L:
        out = out[:, :, :L]
    return out


if __name__ == "__main__":
    # Small shapes consistent with the module: Conv1d expects (N, C_in, L).
    N, C_in, C_out, L = 2, 4, 8, 16

    key = jax.random.PRNGKey(0)
    kx, kw, kb = jax.random.split(key, 3)

    x = jax.random.normal(kx, (N, C_in, L), dtype=jnp.float32)
    # Synthetic parameters (PyTorch shapes: weight (C_out, C_in, 1) -> squeezed, bias (C_out,)).
    weight = jax.random.normal(kw, (C_out, C_in), dtype=jnp.float32) * 0.1
    bias = jax.random.normal(kb, (C_out,), dtype=jnp.float32) * 0.1

    out = outconv_forward(x, weight, bias)
    out = jax.block_until_ready(out)

    # Reference check: same math as nn.Conv1d with kernel_size=1.
    ref = jnp.einsum("oc,ncl->nol", weight, x) + bias[None, :, None]
    assert out.shape == (N, C_out, L)
    assert jnp.allclose(out, ref, atol=1e-5, rtol=1e-5)

    print("KERNEL_OK")
</pallas_src>

<mosaic_0001>
module attributes {stable_mosaic.version = 11 : i64} {
  func.func @_outconv_kernel(%arg0: i32, %arg1: i32, %arg2: memref<1x4x128xf32, #tpu.memory_space<vmem>>, %arg3: memref<8x4xf32, #tpu.memory_space<vmem>>, %arg4: memref<8x1xf32, #tpu.memory_space<vmem>>, %arg5: memref<1x8x128xf32, #tpu.memory_space<vmem>>) attributes {dimension_semantics = [#tpu.dimension_semantics<parallel>, #tpu.dimension_semantics<parallel>], iteration_bounds = array<i64: 2, 1>, scalar_prefetch = 0 : i64, scratch_operands = 0 : i64, tpu.core_type = #tpu.core_type<tc>, window_params = [{transform_indices = @transform_0, window_bounds = array<i64: 1, 4, 128>}, {pipeline_mode = #tpu.pipeline_mode<synchronous>, transform_indices = @transform_1, window_bounds = array<i64: 8, 4>}, {pipeline_mode = #tpu.pipeline_mode<synchronous>, transform_indices = @transform_2, window_bounds = array<i64: 8, 1>}, {transform_indices = @transform_3, window_bounds = array<i64: 1, 8, 128>}]} {
    %c0 = arith.constant 0 : index
    %c0_0 = arith.constant 0 : index
    %0 = vector.load %arg3[%c0, %c0_0] : memref<8x4xf32, #tpu.memory_space<vmem>>, vector<8x4xf32>
    %c0_1 = arith.constant 0 : index
    %c0_2 = arith.constant 0 : index
    %c0_3 = arith.constant 0 : index
    %1 = vector.load %arg2[%c0_1, %c0_2, %c0_3] : memref<1x4x128xf32, #tpu.memory_space<vmem>>, vector<1x4x128xf32>
    %2 = vector.shape_cast %1 : vector<1x4x128xf32> to vector<4x128xf32>
    %cst = arith.constant dense<0.000000e+00> : vector<8x128xf32>
    %3 = tpu.matmul %0, %2, %cst {dimension_numbers = #tpu.dot_dimension_numbers<[1], [0], [0], [1], [0, 0, 1, 1], [], []>} : vector<8x4xf32>, vector<4x128xf32>, vector<8x128xf32> -> vector<8x128xf32>
    %c0_4 = arith.constant 0 : index
    %c0_5 = arith.constant 0 : index
    %4 = vector.load %arg4[%c0_4, %c0_5] : memref<8x1xf32, #tpu.memory_space<vmem>>, vector<8x1xf32>
    %5 = vector.broadcast %4 : vector<8x1xf32> to vector<8x128xf32>
    %6 = arith.addf %3, %5 : vector<8x128xf32>
    %c0_6 = arith.constant 0 : index
    %c0_7 = arith.constant 0 : index
    %c0_8 = arith.constant 0 : index
    %7 = vector.load %arg5[%c0_6, %c0_7, %c0_8] : memref<1x8x128xf32, #tpu.memory_space<vmem>>, vector<1x8x128xf32>
    %8 = vector.shape_cast %7 : vector<1x8x128xf32> to vector<8x128xf32>
    %9 = vector.shape_cast %6 : vector<8x128xf32> to vector<1x8x128xf32>
    tpu.vector_store %arg5[%c0_6, %c0_7, %c0_8], %9 {strides = array<i32>} : memref<1x8x128xf32, #tpu.memory_space<vmem>>, vector<1x8x128xf32>,
    return
  }
  func.func @transform_0(%arg0: i32, %arg1: i32) -> (i32, i32, i32) {
    %c0_i32 = arith.constant 0 : i32
    %c0_i32_0 = arith.constant 0 : i32
    return %arg0, %c0_i32, %arg1 : i32, i32, i32
  }
  func.func @transform_1(%arg0: i32, %arg1: i32) -> (i32, i32) {
    %c0_i32 = arith.constant 0 : i32
    %c0_i32_0 = arith.constant 0 : i32
    %c0_i32_1 = arith.constant 0 : i32
    return %c0_i32, %c0_i32_0 : i32, i32
  }
  func.func @transform_2(%arg0: i32, %arg1: i32) -> (i32, i32) {
    %c0_i32 = arith.constant 0 : i32
    %c0_i32_0 = arith.constant 0 : i32
    %c0_i32_1 = arith.constant 0 : i32
    return %c0_i32, %c0_i32_0 : i32, i32
  }
  func.func @transform_3(%arg0: i32, %arg1: i32) -> (i32, i32, i32) {
    %c0_i32 = arith.constant 0 : i32
    %c0_i32_0 = arith.constant 0 : i32
    return %arg0, %c0_i32, %arg1 : i32, i32, i32
  }
}

</mosaic_0001>

<bundles_post_ra>
// kernel: tpu_custom_call.1
= control target key start
LH: loop header
LB: loop body
LE: loop exit
PB: predicated region body
PF: predicated region fallthrough
CT: control target
= control target key end

     0   :  { %8 = vsyncpa [#allocation3], 0  ;;  %s590_s0 = inlined_call_operand.vmem [shape: f32[2,4,128], index: 0, kind: input, shape index: {}]   ;;  %s591_s1 = inlined_call_operand.vmem [shape: f32[8,4], index: 1, kind: input, shape index: {}]   ;;  %s592_s2 = inlined_call_operand.vmem [shape: f32[8,1], index: 2, kind: input, shape index: {}]   ;;  %s593_s3 = inlined_call_operand.hbm [shape: f32[2,8,128], index: 3, kind: output, shape index: {}]  }
   0x1   :  { %10 = vsyncpa [#allocation3 + $0x1], 0  ;;  %s487_s12 = smov 0   ;;  %s489_s13 = smov 0  }
   0x2   :  { %s491_s14 = smov 0   ;;  %s493_s15 = smov 0  }
   0x3   :  { %s495_s16 = smov 0   ;;  %s497_s17 = smov 0  }
   0x4 LB: > { %s316_s18 = sadd.s32 4294967295, %s464_s17   ;;  %s317_s19 = sadd.s32 4294967294, %s464_s17   ;;  %s464_s17 = sphi %s497_s17, %s16_s17   ;;  %s460_s16 = sphi %s495_s16, %s600_s16   ;;  %s456_s15 = sphi %s493_s15, %s599_s15   ;;  %s452_s14 = sphi %s491_s14, %s598_s14   ;;  %s448_s13 = sphi %s489_s13, %s597_s13   ;;  %s444_s12 = sphi %s487_s12, %s596_s12  }
   0x5   : > { %s28_s20 = sadd.s32 1, %s460_s16  ;;  %s107_s21 = sadd.s32 1, %s452_s14 }
   0x6   : > { %p30_p0 = scmp.ge.s32.totalorder %s28_s20, 2  ;;  %p117_p1 = scmp.ne.s32.totalorder %s452_s14, %s448_s13 }
   0x7   : > { %p118_p2 = scmp.eq.s32.totalorder %s316_s18, 1  ;;  %p123_p3 = scmp.ne.s32.totalorder %s448_s13, %s444_s12 }
   0x8   : > { %s602_s20 = smov (%p30_p0, %s28_s20), 0  ;;  %p124_p5 = scmp.eq.s32.totalorder %s317_s19, 1 }
   0x9   : > { %p527_p4 = por %p118_p2, %p117_p1  ;;  %s102_s23 = ssub.s32 %s460_s16, %s602_s20 }
   0xa   : > { %p320_p6 = scmp.ge.s32.totalorder %s464_s17, 1  ;;  %p105_p7 = scmp.eq.s32.totalorder %s102_s23, 0 }
   0xb   : > { %p534_p8 = por %p124_p5, %p123_p3  ;;  %p158_p9 = scmp.lt.s32.totalorder %s464_s17, 3 }
   0xc   : > { %s540_s25 = scalar_select %p105_p7, %s452_s14, %s107_s21  }
   0xd   : > { %p159_p10 = pnand %p320_p6, %p158_p9 }
   0xe   : > { %p184_p11 = scmp.lt.s32.totalorder (!%p159_p10), %s456_s15, 1  ;;  %s181_s8 = sand.u32 (!%p159_p10), 1, %s448_s13  }
   0xf   : > { %162 = sbr.rel (%p159_p10) target bundleno = 157 (0x9d), region = 32  ;;  %s321_s9 = sshll.u32 (!%p159_p10), %s181_s8, 3 }
  0x10   : > { %s326_s10 = sshll.u32 (!%p159_p10), %s456_s15, 3  ;;  %s183_s21 = scalar_lea.vmem (!%p159_p10), [#allocation2], %s321_s9 }
  0x11   : > { %s240_s19 = scalar_lea.hbm (!%p159_p10), %s593_s3, %s326_s10  ;;  %s242_s23 = sshll.u32 (!%p159_p10), %s183_s21, 4  ;;  %s243_s23 = int_to_ptr.vmem [resolvable:$true] %s242_s23 }
  0x12   : > { %s244_s26 = sshll.u32 (!%p159_p10), %s240_s19, 4  ;;  %s229_s27 = scalar_lea.sflag (!%p159_p10), [#allocation3], %s181_s8  ;;  %s245_s26 = int_to_ptr.hbm [resolvable:$true] %s244_s26 }
  0x13   : > { %s406_s4 = scalar_lea.hbm (!%p159_p10), %s593_s3, 16 }
  0x14   : > { %v193_v0 = vld [vmem:[%s592_s2] sm:$0xff]  ;;  %v466_v1 = vmov 0   ;;  %s185_s28 = scalar_select %p184_p11, %s456_s15, 1  ;;  %vm203_vm0 = vcmask 1043456   ;;  %vm199_vm1 = vcmask 31744  }
  0x15   : > { %385 = vset.pattern.permute.xlu0 %v466_v1  ;;  %v191_v2 = vld [vmem:[%s591_s1] sm:$0xff] }
  0x16   : > { %196 = vperm.xlu0 %385, %v193_v0   ;;  %s322_s29 = sshll.u32 %s185_s28, 2  ;;  %s400_s28 = sshra.s32 %s245_s26, 4  ;;  %s401_s28 = int_to_ptr.hbm [resolvable:$true] %s400_s28 }
  0x17   : > { %s190_s5 = scalar_lea.vmem %s590_s0, %s322_s29  ;;  %s402_s29 = scalar_lea.hbm %s401_s28, 8 }
  0x18   : > { %v192_v3 = vld [vmem:[%s190_s5] sm:$0xf]  ;;  %p403_p12 = scmp.ne.s32.totalorder %s401_s28, %s402_s29  ;;  %p407_p1 = scmp.lt.s32.totalorder %s401_s28, %s593_s3 }
  0x19   : > { %323 = vmatpush.msk.msra.mxu0 %vm203_vm0, %v192_v3  ;;  %p408_p2 = scmp.lt.s32.totalorder %s406_s4, %s402_s29 }
  0x1a   : > { %324 = vmatmul.msk.f32.vlgmr.msra.gmra.mxu0 %vm199_vm1, %v191_v2  ;;  %p404_p13 = pnand %p403_p12, %p527_p4 }
  0x1b   : > { %p409_p3 = por %p408_p2, %p407_p1 }
  0x1c   : > { %p405_p0 = pneg %p404_p13 }
  0x1e   : > { %p410_p5 = pnand %p409_p3, %p405_p0 }
  0x88   : > { %v197_v4 = vpop.permute.xlu0 %196 }
  0x97   : > { %v224_v5 = vpop.f32.mrf.mxu0 }
  0x98   : > { %v225_v6 = vadd.f32 %v224_v5, %v197_v4 }
  0x9a   : > { %227 = vst [vmem:[%s183_s21] sm:$0xff] %v225_v6 }
  0x9b   : > { %413 = shalt.err (!%p410_p5)
}
  0x9c   : > { %329 = dma.vmem_to_hbm [thread:$0]  (%p527_p4), %s243_s23, 128, %s245_s26, %s229_s27  }
  0x9d PF: > { %p335_p6 = scmp.ge.s32.totalorder %s464_s17, 2  ;;  %s256_s7 = sand.u32 1, %s444_s12  }
  0x9e   : > { %s257_s8 = scalar_lea.sflag [#allocation3], %s256_s7 }
  0x9f   : > { %p332_p7 = pnand %p335_p6, %p534_p8 }
  0xa1   : > { %p333_p9 = pneg %p332_p7 }
  0xa3   : > { %439 = dma.done.wait (%p333_p9), %s257_s8, 128  }
  0xa4   : > { %441 = vsyncadd (%p333_p9), %s257_s8, 4294967168  ;;  %s16_s17 = sadd.s32 1, %s464_s17   ;;  %s596_s12 = smov %s448_s13 }
  0xa5   : > { %p13_p10 = scmp.ge.s32.totalorder %s16_s17, 4   ;;  %s597_s13 = smov %s452_s14 }
  0xa6   : > { %s598_s14 = smov %s540_s25  ;;  %s599_s15 = smov %s460_s16 }
  0xa7   : > { %s600_s16 = smov %s602_s20  ;;  %15 = sbr.rel (!%p13_p10) target bundleno = 4 (0x4), region = 67 }
  0xac   :  { %263 = vsyncpa [#allocation3], 1 }
  0xad   :  { %265 = vsyncpa [#allocation3 + $0x1], 1 }

</bundles_post_ra>
